<compile_context>
chip_gen: v6e
topology: v6e:2x2x1
jax: 0.10.0
libtpu: 0.0.40
codegen_flags: <defaults>
</compile_context>

<pallas_src>
import math
import functools

import jax
import jax.numpy as jnp
from jax.experimental import pallas as pl
from jax.experimental.pallas import tpu as pltpu


def _timestep_embedder_kernel(t_ref, freqs_ref, w1_ref, b1_ref, s1_ref,
                              w2_ref, b2_ref, s2_ref, out_ref,
                              *, half, timestep_scale, quantized_weights):
    # ---- sinusoidal timestep embedding ----
    # Recomputed per N-tile: FLOPs are free in this weight-DMA-bound kernel and
    # recomputation keeps every grid step independent ("parallel"-safe).
    t = t_ref[...].astype(jnp.float32)                       # (B, 1)
    if timestep_scale is not None:
        t = t * jnp.float32(timestep_scale)
    args = t * freqs_ref[...]                                # (B, half)  f32
    cos_e = jnp.cos(args)
    sin_e = jnp.sin(args)

    # MXU dtype: bf16 when weights are streamed as 8-bit (dequantized in VMEM,
    # no integer MXU needed -> works on v5e/v6e/v7x); else the storage dtype.
    mxu_dtype = jnp.bfloat16 if quantized_weights else w1_ref.dtype

    # Static row slices of w1 replace the lane-axis concatenate of [cos, sin].
    # (half is a multiple of the dtype's sublane tile for the shapes used here,
    #  so these slices are free views, not VMEM copies.)
    w1_cos = w1_ref[0:half, :].astype(mxu_dtype)             # (half, H)
    w1_sin = w1_ref[half:2 * half, :].astype(mxu_dtype)      # (half, H)

    # ---- MLP: Linear -> SiLU -> Linear (f32 accumulation throughout) ----
    h = (jnp.dot(cos_e.astype(mxu_dtype), w1_cos, preferred_element_type=jnp.float32)
         + jnp.dot(sin_e.astype(mxu_dtype), w1_sin, preferred_element_type=jnp.float32))
    if quantized_weights:
        h = h * s1_ref[...]                                  # per-out-channel dequant
    h = h + b1_ref[...]                                      # (B, H) f32
    h = h * jax.nn.sigmoid(h)                                # SiLU, f32 (portable)

    o = jnp.dot(h.astype(mxu_dtype), w2_ref[...].astype(mxu_dtype),
                preferred_element_type=jnp.float32)
    if quantized_weights:
        o = o * s2_ref[...]
    o = o + b2_ref[...]
    out_ref[...] = o.astype(out_ref.dtype)                   # (B, tn)


def _quantize_per_out_channel(w, qdtype):
    """Per-output-channel symmetric quantization of an (in, out) weight."""
    amax = jnp.maximum(jnp.max(jnp.abs(w), axis=0, keepdims=True), 1e-30)  # (1, out)
    if jnp.issubdtype(jnp.dtype(qdtype), jnp.integer):
        scale = amax / 127.0
        q = jnp.clip(jnp.round(w / scale), -127, 127).astype(qdtype)
    else:  # fp8 path (v7x-friendly): scale into the representable range
        qmax = float(jnp.finfo(qdtype).max)
        scale = amax / qmax
        q = (w / scale).astype(qdtype)
    return q, scale.astype(jnp.float32)


def _pick_block_n(H, F, w_itemsize, *, vmem_budget_bytes, min_tiles=2):
    """Largest output-column tile (multiple of 128, dividing H) whose pipeline
    footprint fits the VMEM budget, preferring >= `min_tiles` grid steps so the
    "parallel" grid axis can split the w2 stream across v7x's two TensorCores
    (v5e/v6e are single-core, where the extra step costs ~0.35 us — negligible)."""
    if H % 128 != 0:
        return H                                   # block must equal the full dim

    def fits(tn, n_buf):
        w1_res = F * H * w_itemsize                # resident, single-buffered
        w2_str = n_buf * H * tn * w_itemsize       # streamed column tiles
        dequant = 2 * (F * H + H * tn) if w_itemsize == 1 else 0   # bf16 temporaries
        misc = 8 * H * 4 + 8 * tn * 4 + (2 << 20)  # biases/scales/out + slack
        return w1_res + w2_str + dequant + misc <= vmem_budget_bytes

    for tn in range(H - 128, 0, -128):             # biggest proper tile first
        if H % tn == 0 and H // tn >= min_tiles and fits(tn, 3):
            return tn
    return H if fits(H, 1) else 128


def timestep_embedder(t, w1, b1, w2, b2, *, out_dtype=jnp.float32,
                      max_period=10000.0, timestep_scale=None,
                      compute_dtype=jnp.bfloat16, block_n=None,
                      vmem_limit_bytes=48 << 20):
    """t: (B,) timesteps.  w1: (F, H), w2: (H, H) stored (in, out).

    Returns (B, H) in out_dtype.  Weights are streamed in `compute_dtype`:
      * bf16 (default)  -> halves weight HBM traffic vs f32
      * int8 / fp8-e4m3 -> weight-only quantization with per-output-channel
                           scales, dequantized to bf16 in VMEM (halves it again)
    Accumulation is always f32.
    """
    B = t.shape[0]
    F, H = w1.shape
    if F % 2:
        # TODO(synk): dim%2 zero-pad branch of timestep_embedding not implemented.
        raise NotImplementedError("odd frequency_embedding_size not supported")
    half = F // 2

    cdt = jnp.dtype(compute_dtype)
    quantized = cdt.itemsize == 1                  # int8 / fp8 weight-only quant

    if quantized:
        w1c, s1 = _quantize_per_out_channel(w1.astype(jnp.float32), compute_dtype)
        w2c, s2 = _quantize_per_out_channel(w2.astype(jnp.float32), compute_dtype)
    else:
        w1c = w1.astype(compute_dtype)
        w2c = w2.astype(compute_dtype)
        s1 = jnp.ones((1, H), jnp.float32)         # unused (static flag skips mul)
        s2 = jnp.ones((1, H), jnp.float32)

    b1_2d = b1.reshape(1, H).astype(jnp.float32)
    b2_2d = b2.reshape(1, H).astype(jnp.float32)
    # t stays a (B, 1) VMEM block (lane-width-1 masked load accepted knowingly;
    # negligible next to the weight stream).
    t2d = t.reshape(B, 1).astype(jnp.float32)

    # Precomputed frequency table (compile-time constant given F, max_period).
    freqs = jnp.exp(
        jnp.arange(half, dtype=jnp.float32) * (-math.log(max_period) / half)
    ).reshape(1, half)

    # ---- output-column tiling: few, big tiles; >=2 when possible (v7x split) ----
    w_item = cdt.itemsize
    if block_n is None:
        tn = _pick_block_n(H, F, w_item,
                           vmem_budget_bytes=int(vmem_limit_bytes * 0.85))
    else:
        tn = int(block_n)
        if H % tn != 0 or (tn != H and tn % 128 != 0):
            tn = H
    num_tiles = H // tn
    # Streamed-w2 buffer depth: 3 keeps the HBM stream back-to-back when there
    # are enough steps to prefetch; fewer buffers when the grid is tiny.
    w2_bufs = 1 if num_tiles == 1 else (2 if num_tiles == 2 else 3)

    out_item = jnp.dtype(out_dtype).itemsize
    cost = pl.CostEstimate(
        flops=int(2 * B * F * H + 2 * B * H * H),
        transcendentals=int(B * (F + H)),          # cos+sin (F) + sigmoid (H)
        bytes_accessed=int((F * H + H * H) * w_item + B * H * out_item
                           + (B + half + 6 * H) * 4),
    )

    kernel = functools.partial(
        _timestep_embedder_kernel, half=half, timestep_scale=timestep_scale,
        quantized_weights=quantized)

    return pl.pallas_call(
        kernel,
        out_shape=jax.ShapeDtypeStruct((B, H), out_dtype),
        grid=(num_tiles,),
        in_specs=[
            # Constant-index operands: DMA'd once, single-buffered (a second
            # pipeline buffer would be pure VMEM waste).
            pl.BlockSpec((B, 1), lambda j: (0, 0), pipeline_mode=pl.Buffered(1)),
            pl.BlockSpec((1, half), lambda j: (0, 0), pipeline_mode=pl.Buffered(1)),
            pl.BlockSpec((F, H), lambda j: (0, 0), pipeline_mode=pl.Buffered(1)),
            pl.BlockSpec((1, H), lambda j: (0, 0), pipeline_mode=pl.Buffered(1)),
            pl.BlockSpec((1, H), lambda j: (0, 0), pipeline_mode=pl.Buffered(1)),
            # Streamed w2 column tiles: the only real HBM cost of this kernel.
            pl.BlockSpec((H, tn), lambda j: (0, j),
                         pipeline_mode=pl.Buffered(w2_bufs)),
            pl.BlockSpec((1, tn), lambda j: (0, j)),     # b2 column tile
            pl.BlockSpec((1, tn), lambda j: (0, j)),     # s2 column tile
        ],
        out_specs=pl.BlockSpec((B, tn), lambda j: (0, j)),
        compiler_params=pltpu.CompilerParams(
            dimension_semantics=("parallel",),           # megacore split on v7x
            vmem_limit_bytes=int(vmem_limit_bytes)),     # fits v7x 64 MiB, raises v5e/v6e defaults
        cost_estimate=cost,
    )(t2d, freqs, w1c, b1_2d, s1, w2c, b2_2d, s2)


def _reference(t, w1, b1, w2, b2, *, out_dtype, compute_dtype,
               max_period=10000.0, timestep_scale=None):
    """Pure-JAX reference mirroring the PyTorch module with the same dtype
    convention as the kernel (embedding / weights in compute_dtype, f32 accum)."""
    t = t.astype(jnp.float32)
    if timestep_scale is not None:
        t = t * timestep_scale
    F = w1.shape[0]
    half = F // 2
    freqs = jnp.exp(
        -math.log(max_period) / half * jnp.arange(half, dtype=jnp.float32))
    args = t[:, None] * freqs[None]
    emb = jnp.concatenate([jnp.cos(args), jnp.sin(args)], axis=-1)
    emb = emb.astype(compute_dtype)
    h = jnp.dot(emb, w1.astype(compute_dtype),
                preferred_element_type=jnp.float32) + b1.astype(jnp.float32)
    h = h * jax.nn.sigmoid(h)
    h = h.astype(compute_dtype)
    o = jnp.dot(h, w2.astype(compute_dtype),
                preferred_element_type=jnp.float32) + b2.astype(jnp.float32)
    return o.astype(out_dtype)


if __name__ == "__main__":
    B = 8                     # batch of timesteps
    FREQ = 256                # frequency_embedding_size (module default)
    HIDDEN = 256              # hidden_size (small demo value; exercises 2-tile grid)

    key = jax.random.PRNGKey(0)
    k_t, k_w1, k_b1, k_w2, k_b2 = jax.random.split(key, 5)

    t = jax.random.uniform(k_t, (B,), jnp.float32, minval=0.0, maxval=1000.0)
    w1 = jax.random.normal(k_w1, (FREQ, HIDDEN), jnp.float32) * 0.02
    b1 = jax.random.normal(k_b1, (HIDDEN,), jnp.float32) * 0.02
    w2 = jax.random.normal(k_w2, (HIDDEN, HIDDEN), jnp.float32) * 0.02
    b2 = jax.random.normal(k_b2, (HIDDEN,), jnp.float32) * 0.02

    # --- exact-semantics check in f32 (tight tolerance) ---
    out_f32 = timestep_embedder(t, w1, b1, w2, b2, out_dtype=jnp.float32,
                                compute_dtype=jnp.float32)
    out_f32 = jax.block_until_ready(out_f32)
    ref_f32 = _reference(t, w1, b1, w2, b2, out_dtype=jnp.float32,
                         compute_dtype=jnp.float32)
    assert out_f32.shape == (B, HIDDEN)
    assert jnp.allclose(out_f32, ref_f32, atol=1e-4, rtol=1e-4), \
        "f32 mismatch vs reference"

    # --- timestep_scale path ---
    out_sc = timestep_embedder(t, w1, b1, w2, b2, out_dtype=jnp.float32,
                               compute_dtype=jnp.float32, timestep_scale=0.5)
    out_sc = jax.block_until_ready(out_sc)
    ref_sc = _reference(t, w1, b1, w2, b2, out_dtype=jnp.float32,
                        compute_dtype=jnp.float32, timestep_scale=0.5)
    assert jnp.allclose(out_sc, ref_sc, atol=1e-4, rtol=1e-4), \
        "timestep_scale mismatch vs reference"

    # --- recommended bf16-weight config (halves weight HBM traffic) ---
    out_bf16 = timestep_embedder(t, w1, b1, w2, b2, out_dtype=jnp.float32,
                                 compute_dtype=jnp.bfloat16)
    out_bf16 = jax.block_until_ready(out_bf16)
    ref_bf16 = _reference(t, w1, b1, w2, b2, out_dtype=jnp.float32,
                          compute_dtype=jnp.bfloat16)
    assert jnp.allclose(out_bf16, ref_bf16, atol=5e-3, rtol=5e-2), \
        "bf16 mismatch vs reference"
    assert jnp.allclose(out_bf16, ref_f32, atol=2e-2, rtol=2e-1), \
        "bf16 drifted too far from f32 reference"

    # --- int8 weight-only streaming (halves the weight HBM stream again;
    #     dequantized to bf16 in VMEM so no integer MXU is required) ---
    out_i8 = timestep_embedder(t, w1, b1, w2, b2, out_dtype=jnp.float32,
                               compute_dtype=jnp.int8)
    out_i8 = jax.block_until_ready(out_i8)
    assert jnp.allclose(out_i8, ref_f32, atol=1e-2, rtol=1e-1), \
        "int8 weight-only path drifted too far from f32 reference"

    print("KERNEL_OK")
</pallas_src>

<mosaic_0001>
module attributes {stable_mosaic.version = 11 : i64} {
  func.func @_timestep_embedder_kernel(%arg0: i32, %arg1: memref<8x1xf32, #tpu.memory_space<vmem>>, %arg2: memref<1x128xf32, #tpu.memory_space<vmem>>, %arg3: memref<256x256xf32, #tpu.memory_space<vmem>>, %arg4: memref<1x256xf32, #tpu.memory_space<vmem>>, %arg5: memref<1x256xf32, #tpu.memory_space<vmem>>, %arg6: memref<256x128xf32, #tpu.memory_space<vmem>>, %arg7: memref<1x128xf32, #tpu.memory_space<vmem>>, %arg8: memref<1x128xf32, #tpu.memory_space<vmem>>, %arg9: memref<8x128xf32, #tpu.memory_space<vmem>>) attributes {dimension_semantics = [#tpu.dimension_semantics<parallel>], iteration_bounds = array<i64: 2>, scalar_prefetch = 0 : i64, scratch_operands = 0 : i64, tpu.core_type = #tpu.core_type<tc>, window_params = [{pipeline_mode = #tpu.pipeline_mode<synchronous>, transform_indices = @transform_0, window_bounds = array<i64: 8, 1>}, {pipeline_mode = #tpu.pipeline_mode<synchronous>, transform_indices = @transform_1, window_bounds = array<i64: 1, 128>}, {pipeline_mode = #tpu.pipeline_mode<synchronous>, transform_indices = @transform_2, window_bounds = array<i64: 256, 256>}, {pipeline_mode = #tpu.pipeline_mode<synchronous>, transform_indices = @transform_3, window_bounds = array<i64: 1, 256>}, {pipeline_mode = #tpu.pipeline_mode<synchronous>, transform_indices = @transform_4, window_bounds = array<i64: 1, 256>}, {pipeline_mode = #tpu.pipeline_mode<double_buffered>, transform_indices = @transform_5, window_bounds = array<i64: 256, 128>}, {transform_indices = @transform_6, window_bounds = array<i64: 1, 128>}, {transform_indices = @transform_7, window_bounds = array<i64: 1, 128>}, {transform_indices = @transform_8, window_bounds = array<i64: 8, 128>}]} {
    %c0 = arith.constant 0 : index
    %c0_0 = arith.constant 0 : index
    %0 = vector.load %arg1[%c0, %c0_0] : memref<8x1xf32, #tpu.memory_space<vmem>>, vector<8x1xf32>
    %c0_1 = arith.constant 0 : index
    %c0_2 = arith.constant 0 : index
    %1 = vector.load %arg2[%c0_1, %c0_2] : memref<1x128xf32, #tpu.memory_space<vmem>>, vector<1x128xf32>
    %2 = vector.broadcast %0 : vector<8x1xf32> to vector<8x128xf32>
    %3 = vector.broadcast %1 : vector<1x128xf32> to vector<8x128xf32>
    %4 = arith.mulf %2, %3 : vector<8x128xf32>
    %5 = math.cos %4 : vector<8x128xf32>
    %6 = math.sin %4 : vector<8x128xf32>
    %c0_3 = arith.constant 0 : index
    %c0_4 = arith.constant 0 : index
    %7 = vector.load %arg3[%c0_3, %c0_4] : memref<256x256xf32, #tpu.memory_space<vmem>>, vector<128x256xf32>
    %c128 = arith.constant 128 : index
    %c0_5 = arith.constant 0 : index
    %8 = vector.load %arg3[%c128, %c0_5] : memref<256x256xf32, #tpu.memory_space<vmem>>, vector<128x256xf32>
    %cst = arith.constant dense<0.000000e+00> : vector<8x256xf32>
    %9 = tpu.matmul %5, %7, %cst {dimension_numbers = #tpu.dot_dimension_numbers<[1], [0], [0], [1], [0, 0, 1, 1], [], []>} : vector<8x128xf32>, vector<128x256xf32>, vector<8x256xf32> -> vector<8x256xf32>
    %cst_6 = arith.constant dense<0.000000e+00> : vector<8x256xf32>
    %10 = tpu.matmul %6, %8, %cst_6 {dimension_numbers = #tpu.dot_dimension_numbers<[1], [0], [0], [1], [0, 0, 1, 1], [], []>} : vector<8x128xf32>, vector<128x256xf32>, vector<8x256xf32> -> vector<8x256xf32>
    %11 = arith.addf %9, %10 : vector<8x256xf32>
    %c0_7 = arith.constant 0 : index
    %c0_8 = arith.constant 0 : index
    %12 = vector.load %arg4[%c0_7, %c0_8] : memref<1x256xf32, #tpu.memory_space<vmem>>, vector<1x256xf32>
    %13 = vector.broadcast %12 : vector<1x256xf32> to vector<8x256xf32>
    %14 = arith.addf %11, %13 : vector<8x256xf32>
    %15 = arith.negf %14 : vector<8x256xf32>
    %16 = math.exp %15 : vector<8x256xf32>
    %cst_9 = arith.constant 1.000000e+00 : f32
    %17 = vector.broadcast %cst_9 : f32 to vector<8x256xf32>
    %18 = arith.addf %17, %16 : vector<8x256xf32>
    %19 = arith.divf %17, %18 : vector<8x256xf32>
    %20 = arith.mulf %14, %19 : vector<8x256xf32>
    %c0_10 = arith.constant 0 : index
    %c0_11 = arith.constant 0 : index
    %21 = vector.load %arg6[%c0_10, %c0_11] : memref<256x128xf32, #tpu.memory_space<vmem>>, vector<256x128xf32>
    %cst_12 = arith.constant dense<0.000000e+00> : vector<8x128xf32>
    %22 = tpu.matmul %20, %21, %cst_12 {dimension_numbers = #tpu.dot_dimension_numbers<[1], [0], [0], [1], [0, 0, 1, 1], [], []>} : vector<8x256xf32>, vector<256x128xf32>, vector<8x128xf32> -> vector<8x128xf32>
    %c0_13 = arith.constant 0 : index
    %c0_14 = arith.constant 0 : index
    %23 = vector.load %arg7[%c0_13, %c0_14] : memref<1x128xf32, #tpu.memory_space<vmem>>, vector<1x128xf32>
    %24 = vector.broadcast %23 : vector<1x128xf32> to vector<8x128xf32>
    %25 = arith.addf %22, %24 : vector<8x128xf32>
    %c0_15 = arith.constant 0 : index
    %c0_16 = arith.constant 0 : index
    %26 = vector.load %arg9[%c0_15, %c0_16] : memref<8x128xf32, #tpu.memory_space<vmem>>, vector<8x128xf32>
    tpu.vector_store %arg9[%c0_15, %c0_16], %25 {strides = array<i32>} : memref<8x128xf32, #tpu.memory_space<vmem>>, vector<8x128xf32>,
    return
  }
  func.func @transform_0(%arg0: i32) -> (i32, i32) {
    %c0_i32 = arith.constant 0 : i32
    %c0_i32_0 = arith.constant 0 : i32
    %c0_i32_1 = arith.constant 0 : i32
    return %c0_i32, %c0_i32_0 : i32, i32
  }
  func.func @transform_1(%arg0: i32) -> (i32, i32) {
    %c0_i32 = arith.constant 0 : i32
    %c0_i32_0 = arith.constant 0 : i32
    %c0_i32_1 = arith.constant 0 : i32
    return %c0_i32, %c0_i32_0 : i32, i32
  }
  func.func @transform_2(%arg0: i32) -> (i32, i32) {
    %c0_i32 = arith.constant 0 : i32
    %c0_i32_0 = arith.constant 0 : i32
    %c0_i32_1 = arith.constant 0 : i32
    return %c0_i32, %c0_i32_0 : i32, i32
  }
  func.func @transform_3(%arg0: i32) -> (i32, i32) {
    %c0_i32 = arith.constant 0 : i32
    %c0_i32_0 = arith.constant 0 : i32
    %c0_i32_1 = arith.constant 0 : i32
    return %c0_i32, %c0_i32_0 : i32, i32
  }
  func.func @transform_4(%arg0: i32) -> (i32, i32) {
    %c0_i32 = arith.constant 0 : i32
    %c0_i32_0 = arith.constant 0 : i32
    %c0_i32_1 = arith.constant 0 : i32
    return %c0_i32, %c0_i32_0 : i32, i32
  }
  func.func @transform_5(%arg0: i32) -> (i32, i32) {
    %c0_i32 = arith.constant 0 : i32
    %c0_i32_0 = arith.constant 0 : i32
    return %c0_i32, %arg0 : i32, i32
  }
  func.func @transform_6(%arg0: i32) -> (i32, i32) {
    %c0_i32 = arith.constant 0 : i32
    %c0_i32_0 = arith.constant 0 : i32
    return %c0_i32, %arg0 : i32, i32
  }
  func.func @transform_7(%arg0: i32) -> (i32, i32) {
    %c0_i32 = arith.constant 0 : i32
    %c0_i32_0 = arith.constant 0 : i32
    return %c0_i32, %arg0 : i32, i32
  }
  func.func @transform_8(%arg0: i32) -> (i32, i32) {
    %c0_i32 = arith.constant 0 : i32
    %c0_i32_0 = arith.constant 0 : i32
    return %c0_i32, %arg0 : i32, i32
  }
}

</mosaic_0001>

<bundles_post_ra>
// kernel: tpu_custom_call.1
= control target key start
LH: loop header
LB: loop body
LE: loop exit
PB: predicated region body
PF: predicated region fallthrough
CT: control target
= control target key end

     0   :  { %13 = vsyncpa [#allocation3], 0  ;;  %s1618_s0 = inlined_call_operand.vmem [shape: f32[8,1], index: 0, kind: input, shape index: {}]   ;;  %s1619_s1 = inlined_call_operand.vmem [shape: f32[1,128], index: 1, kind: input, shape index: {}]   ;;  %s1620_s2 = inlined_call_operand.hbm [shape: f32[256,256], index: 2, kind: input, shape index: {}]   ;;  %s1621_s3 = inlined_call_operand.vmem [shape: f32[1,256], index: 3, kind: input, shape index: {}]   ;;  %s1622_s4 = inlined_call_operand.vmem [shape: f32[1,256], index: 4, kind: input, shape index: {}]   ;;  %s1623_s5 = inlined_call_operand.hbm [shape: f32[256,256], index: 5, kind: input, shape index: {}]   ;;  %s1624_s6 = inlined_call_operand.vmem [shape: f32[1,256], index: 6, kind: input, shape index: {}]   ;;  %s1625_s7 = inlined_call_operand.vmem [shape: f32[1,256], index: 7, kind: input, shape index: {}]   ;;  %s1626_s8 = inlined_call_operand.hbm [shape: f32[8,256], index: 8, kind: output, shape index: {}]  }
   0x1   :  { %14 = vsyncpa [#allocation6], 0 }
   0x2   :  { %16 = vsyncpa [#allocation6 + $0x1], 0 }
   0x3   :  { %17 = vsyncpa [#allocation4], 0 }
   0x4   :  { %19 = vsyncpa [#allocation4 + $0x1], 0  ;;  %s1376_s27 = smov 0   ;;  %s1378_s4 = smov 0  }
   0x5   :  { %s1380_s28 = smov 0   ;;  %s1382_s29 = smov 0  }
   0x6 LB: > { %s1397_s7 = sadd.s32 4294967295, %s1314_s29   ;;  %s1045_s30 = sadd.s32 4294967294, %s1314_s29   ;;  %s1314_s29 = sphi %s1382_s29, %s1650_s29   ;;  %s1310_s28 = sphi %s1380_s28, %s1649_s28   ;;  %s1306_s4 = sphi %s1378_s4, %s1648_s4   ;;  %s1302_s27 = sphi %s1376_s27, %s1647_s27  }
   0x7   : > { %s1401_s9 = sadd.s32 1, %s1314_s29   ;;  %s137_s10 = sadd.s32 1, %s1310_s28 }
   0x8   : > { %s134_s11 = ssub.s32 %s1314_s29, %s1401_s9  ;;  %p144_p0 = scmp.ne.s32.totalorder %s1310_s28, %s1306_s4 }
   0x9   : > { %p135_p1 = scmp.eq.s32.totalorder %s134_s11, 0  ;;  %p145_p2 = scmp.eq.s32.totalorder %s1314_s29, 0 }
   0xa   : > { %p150_p3 = scmp.ne.s32.totalorder %s1306_s4, %s1302_s27  ;;  %p1630_p4 = scmp.eq.s32.totalorder %s1397_s7, 0 }
   0xb   : > { %s1413_s12 = scalar_select %p135_p1, %s1310_s28, %s137_s10  }
   0xc   : > { %p1415_p5 = por %p145_p2, %p144_p0  ;;  %p1421_p6 = por %p1630_p4, %p150_p3 }
   0xd   : > { %1631 = sst [smem:[#allocation11_spill]] %s1413_s12  ;;  %p226_p7 = scmp.eq.s32.totalorder %s1397_s7, 1 }
   0xe   : > { %s1633_s14 = scalar_select %p1421_p6, 1, 0 }
   0xf   : > { %p232_p8 = scmp.eq.s32.totalorder %s1045_s30, 1  ;;  %p1046_p9 = scmp.ge.s32.totalorder %s1314_s29, 1 }
  0x10   : > { %p239_p10 = scmp.lt.s32.totalorder %s1314_s29, 3  ;;  %p1428_p11 = por %p226_p7, %p144_p0 }
  0x11   : > { %p1432_p12 = por %p232_p8, %p150_p3  ;;  %s1316_s18 = smov [#allocation2]  }
  0x12   : > { %s1634_s15 = scalar_select %p1428_p11, 1, 0 }
  0x13   : > { %s1635_s16 = scalar_select %p1432_p12, 1, 0 }
  0x14   : > { %p1436_p13 = pnand %p1046_p9, %p239_p10  ;;  %s257_s19 = sshll.u32 %s1316_s18, 4  ;;  %s258_s19 = int_to_ptr.vmem [resolvable:$true] %s257_s19 }
  0x15   : > { %p1131_p3 = scmp.lt.s32.totalorder %s1314_s29, 2  ;;  %s277_s21 = sand.u32 1, %s1310_s28  }
  0x16   : > { %s1636_s17 = scalar_select %p1436_p13, 1, 0 }
  0x17   : > { %p1118_p1 = pneg %p1436_p13  ;;  %s1203_s22 = scalar_lea.vmem %s258_s19, 8192 }
  0x18   : > { %p1204_p8 = scmp.ne.s32.totalorder %s258_s19, %s1203_s22  ;;  %p1211_p12 = scmp.lt.s32.totalorder %s258_s19, %s258_s19 }
  0x19   : > { %p1444_p2 = pnand %p1118_p1, %p1630_p4  ;;  %p1212_p11 = scmp.lt.s32.totalorder %s1203_s22, %s1203_s22 }
  0x1b   : > { %p1194_p7 = pneg %p1444_p2  ;;  %p1213_p6 = por %p1212_p11, %p1211_p12 }
  0x1d   : > { %p1206_p9 = pnand %p1204_p8, %p1194_p7 }
  0x1f   : > { %p1207_p10 = pneg %p1206_p9 }
  0x21   : > { %p1214_p13 = pnand %p1213_p6, %p1207_p10 }
  0x23   : > { %1217 = shalt.err (!%p1214_p13)
}
  0x24   : > { %s1317_s23 = smov 256   ;;  %s1318_s24 = smov 16  }
  0x25   : > { %1121 = dma.hbm_to_vmem [thread:$0]  (!%p1444_p2), %s1620_s2, 8192, %s258_s19, [#allocation3], %s1317_s23, %s1317_s23, %s1318_s24  }
  0x26   : > { %p1464_p1 = pnand %p1131_p3, %p1415_p5  ;;  %s1049_s10 = sshll.u32 %s277_s21, 8 }
  0x27   : > { %s1050_s11 = sshll.u32 %s1314_s29, 7  ;;  %s281_s20 = scalar_lea.vmem [#allocation5], %s1049_s10 }
  0x28   : > { %s1472_s12 = scalar_lea.hbm %s1623_s5, %s1050_s11  ;;  %s287_s25 = sshll.u32 %s281_s20, 4  ;;  %s1474_s25 = int_to_ptr.vmem [resolvable:$true] %s287_s25 }
  0x29   : > { %s1476_s13 = scalar_lea.sflag [#allocation6], %s277_s21  ;;  %s1218_s19 = scalar_lea.hbm %s1472_s12, 4096 }
  0x2a   : > { %p1219_p5 = scmp.ne.s32.totalorder %s1472_s12, %s1218_s19  ;;  %p1220_p6 = pneg %p1464_p1 }
  0x2b   : > { %s1223_s11 = scalar_lea.hbm %s1623_s5, 8192  ;;  %p1224_p13 = scmp.lt.s32.totalorder %s1472_s12, %s1623_s5 }
  0x2c   : > { %p1221_p11 = pnand %p1220_p6, %p1219_p5  ;;  %p1225_p2 = scmp.lt.s32.totalorder %s1223_s11, %s1218_s19 }
  0x2e   : > { %p1222_p12 = pneg %p1221_p11  ;;  %p1226_p3 = por %p1225_p2, %p1224_p13 }
  0x30   : > { %p1227_p7 = pnand %p1226_p3, %p1222_p12 }
  0x32   : > { %1230 = shalt.err (!%p1227_p7)
}
  0x33   : > { %s1231_s21 = scalar_lea.vmem %s1474_s25, 4096  ;;  %s1319_s10 = smov [#allocation5]  }
  0x34   : > { %p1232_p8 = scmp.ne.s32.totalorder %s1474_s25, %s1231_s21  ;;  %s1236_s20 = sshll.u32 %s1319_s10, 4  ;;  %s1237_s20 = int_to_ptr.vmem [resolvable:$false] %s1236_s20 }
  0x35   : > { %s1238_s24 = scalar_lea.vmem %s1237_s20, 8192  ;;  %p1239_p5 = scmp.lt.s32.totalorder %s1474_s25, %s1237_s20 }
  0x36   : > { %p1234_p9 = pnand %p1232_p8, %p1220_p6  ;;  %p1240_p11 = scmp.lt.s32.totalorder %s1238_s24, %s1231_s21 }
  0x38   : > { %p1235_p10 = pneg %p1234_p9  ;;  %p1241_p0 = por %p1240_p11, %p1239_p5 }
  0x3a   : > { %p1242_p4 = pnand %p1241_p0, %p1235_p10 }
  0x3c   : > { %1245 = shalt.err (!%p1242_p4)
}
  0x3d   : > { %s1320_s19 = smov 128   ;;  %s1321_s26 = smov 8  }
  0x3e   : > { %1125 = dma.hbm_to_vmem [thread:$0]  (!%p1464_p1), %s1472_s12, 4096, %s1474_s25, %s1476_s13, %s1317_s23, %s1320_s19, %s1321_s26  }
  0x3f   : > { %p1639_p6 = scmp.ne.s32.totalorder %s1636_s17, 0 }
  0x40   : > { %p1640_p12 = scmp.eq.s32.totalorder (!%p1639_p6), %s1397_s7, 0 }
  0x41   : > { %311 = sbr.rel (%p1639_p6) target bundleno = 731 (0x2db), region = 52 }
  0x46   : > { %1289 = dma.done.wait (%p1640_p12), [#allocation3], 8192   ;;  %p1641_p13 = pmov %p1640_p12 }
  0x47   : > { %s1505_s11 = sand.u32 1, %s1306_s4   ;;  %p1642_p4 = scmp.ne.s32.totalorder %s1633_s14, 0 }
  0x48   : > { %1291 = vsyncadd (%p1641_p13), [#allocation3], 4294959104  ;;  %s1053_s18 = sshll.u32 %s1505_s11, 8  ;;  %s318_s22 = scalar_lea.sflag [#allocation6], %s1505_s11 }
  0x49   : > { %s1509_s30 = scalar_lea.vmem [#allocation5], %s1053_s18 }
  0x4a   : > { %1293 = dma.done.wait (%p1642_p4), %s318_s22, 4096  }
  0x4b   : > { %1295 = vsyncadd (%p1642_p4), %s318_s22, 4294963200  ;;  %v1322_v0 = vmov 0   ;;  %v366_v1 = vld [vmem:[%s1618_s0] sm:$0xff]  ;;  %v650_v2 = vld [vmem:[#allocation2 + $0x1f8] sm:$0xff]  ;;  %p360_p0 = scmp.lt.s32.totalorder %s1397_s7, 1  ;;  %s1054_s10 = sshll.u32 %s1505_s11, 3 }
  0x4c   : > { %1179 = vset.pattern.permute.xlu0 %v1322_v0  ;;  %v618_v3 = vld [vmem:[#allocation2 + $0xf8] sm:$0xff]  ;;  %651 = vmatprep.subr.mxu0 %v650_v2  ;;  %v649_v4 = vld [vmem:[#allocation2 + $0x1f0] sm:$0xff]  ;;  %v648_v6 = vld [vmem:[#allocation2 + $0x1e8] sm:$0xff]  ;;  %v1323_v2 = vmov 0.0   ;;  %s1068_s26 = sshll.u32 %s1397_s7, 7  ;;  %s359_s18 = scalar_lea.vmem [#allocation7], %s1054_s10 }
  0x4d   : > { %370 = vperm.xlu0 %1179, %v366_v1   ;;  %722 = vmatprep.subr.mxu1 %v618_v3  ;;  %v617_v5 = vld [vmem:[#allocation2 + $0xf0] sm:$0xff]  ;;  %v616_v7 = vld [vmem:[#allocation2 + $0xe8] sm:$0xff]  ;;  %v647_v8 = vld [vmem:[#allocation2 + $0x1e0] sm:$0xff]  ;;  %s361_s21 = scalar_select %p360_p0, %s1397_s7, 1 }
  0x4e   : > { %652 = vmatpush1.msra.mxu0 %v649_v4  ;;  %723 = vmatpush1.msra.mxu1 %v617_v5  ;;  %v615_v9 = vld [vmem:[#allocation2 + $0xe0] sm:$0xff]  ;;  %v646_v10 = vld [vmem:[#allocation2 + $0x1d8] sm:$0xff]  ;;  %v645_v12 = vld [vmem:[#allocation2 + $0x1d0] sm:$0xff]  ;;  %s945_s22 = sshll.u32 %s359_s18, 4  ;;  %s943_s17 = scalar_lea.hbm %s1626_s8, %s1068_s26  ;;  %s946_s22 = int_to_ptr.vmem [resolvable:$true] %s945_s22 }
  0x4f   : > { %653 = vmatprep.subr.mxu0 %v648_v6  ;;  %724 = vmatprep.subr.mxu1 %v616_v7  ;;  %v614_v11 = vld [vmem:[#allocation2 + $0xd8] sm:$0xff]  ;;  %v613_v13 = vld [vmem:[#allocation2 + $0xd0] sm:$0xff]  ;;  %v644_v14 = vld [vmem:[#allocation2 + $0x1c8] sm:$0xff]  ;;  %s362_s19 = scalar_lea.vmem %s1624_s6, %s361_s21  ;;  %s932_s14 = scalar_lea.sflag [#allocation4], %s1505_s11 }
  0x50   : > { %654 = vmatpush1.msra.mxu0 %v647_v8  ;;  %725 = vmatpush1.msra.mxu1 %v615_v9  ;;  %v612_v15 = vld [vmem:[#allocation2 + $0xc8] sm:$0xff]  ;;  %v643_v16 = vld [vmem:[#allocation2 + $0x1c0] sm:$0xff]  ;;  %v642_v18 = vld [vmem:[#allocation2 + $0x1b8] sm:$0xff]  ;;  %s1246_s23 = scalar_lea.vmem %s946_s22, 128  ;;  %p1643_p2 = scmp.ne.s32.totalorder %s1634_s15, 0 }
  0x51   : > { %655 = vmatprep.subr.mxu0 %v646_v10  ;;  %726 = vmatprep.subr.mxu1 %v614_v11  ;;  %v611_v17 = vld [vmem:[#allocation2 + $0xc0] sm:$0xff]  ;;  %v610_v19 = vld [vmem:[#allocation2 + $0xb8] sm:$0xff]  ;;  %v641_v20 = vld [vmem:[#allocation2 + $0x1b0] sm:$0xff]  ;;  %p1247_p1 = scmp.ne.s32.totalorder %s946_s22, %s1246_s23  ;;  %s1330_s25 = smov [#allocation7]  }
  0x52   : > { %656 = vmatpush1.msra.mxu0 %v645_v12  ;;  %727 = vmatpush1.msra.mxu1 %v613_v13  ;;  %v609_v21 = vld [vmem:[#allocation2 + $0xb0] sm:$0xff]  ;;  %v640_v22 = vld [vmem:[#allocation2 + $0x1a8] sm:$0xff]  ;;  %v639_v24 = vld [vmem:[#allocation2 + $0x1a0] sm:$0xff]  ;;  %s1250_s13 = sshll.u32 %s1330_s25, 4  ;;  %s1251_s13 = int_to_ptr.vmem [resolvable:$false] %s1250_s13 }
  0x53   : > { %657 = vmatprep.subr.mxu0 %v644_v14  ;;  %728 = vmatprep.subr.mxu1 %v612_v15  ;;  %v608_v23 = vld [vmem:[#allocation2 + $0xa8] sm:$0xff]  ;;  %v607_v25 = vld [vmem:[#allocation2 + $0xa0] sm:$0xff]  ;;  %v638_v26 = vld [vmem:[#allocation2 + $0x198] sm:$0xff]  ;;  %p1248_p3 = pnand %p1247_p1, %p1643_p2  ;;  %s1252_s7 = scalar_lea.vmem %s1251_s13, 256 }
  0x54   : > { %658 = vmatpush1.msra.mxu0 %v643_v16  ;;  %729 = vmatpush1.msra.mxu1 %v611_v17  ;;  %v606_v27 = vld [vmem:[#allocation2 + $0x98] sm:$0xff]  ;;  %v637_v28 = vld [vmem:[#allocation2 + $0x190] sm:$0xff]  ;;  %v636_v30 = vld [vmem:[#allocation2 + $0x188] sm:$0xff]  ;;  %v1324_v16 = vmov 683565275   ;;  %p1253_p8 = scmp.lt.s32.totalorder %s946_s22, %s1251_s13  ;;  %p1254_p9 = scmp.lt.s32.totalorder %s1252_s7, %s1246_s23 }
  0x55   : > { %659 = vmatprep.subr.mxu0 %v642_v18  ;;  %730 = vmatprep.subr.mxu1 %v610_v19  ;;  %v605_v29 = vld [vmem:[#allocation2 + $0x90] sm:$0xff]  ;;  %v604_v31 = vld [vmem:[#allocation2 + $0x88] sm:$0xff]  ;;  %v635_v32 = vld [vmem:[#allocation2 + $0x180] sm:$0xff]  ;;  %v1325_v18 = vmov 2475754826   ;;  %p1249_p7 = pneg %p1248_p3 }
  0x56   : > { %660 = vmatpush1.msra.mxu0 %v641_v20  ;;  %731 = vmatpush1.msra.mxu1 %v609_v21  ;;  %v603_v33 = vld [vmem:[#allocation2 + $0x80] sm:$0xff]  ;;  %v634_v34 = vld [vmem:[#allocation2 + $0x178] sm:$0xff]  ;;  %v633_v36 = vld [vmem:[#allocation2 + $0x170] sm:$0xff]  ;;  %v1326_v21 = vmov 2131351028   ;;  %p1255_p10 = por %p1254_p9, %p1253_p8 }
  0x57   : > { %661 = vmatprep.subr.mxu0 %v640_v22  ;;  %732 = vmatprep.subr.mxu1 %v608_v23  ;;  %v602_v35 = vld [vmem:[#allocation2 + $0x78] sm:$0xff]  ;;  %v601_v37 = vld [vmem:[#allocation2 + $0x70] sm:$0xff]  ;;  %v632_v38 = vld [vmem:[#allocation2 + $0x168] sm:$0xff] }
  0x58   : > { %662 = vmatpush1.msra.mxu0 %v639_v24  ;;  %733 = vmatpush1.msra.mxu1 %v607_v25  ;;  %v600_v39 = vld [vmem:[#allocation2 + $0x68] sm:$0xff]  ;;  %v631_v40 = vld [vmem:[#allocation2 + $0x160] sm:$0xff]  ;;  %v630_v42 = vld [vmem:[#allocation2 + $0x158] sm:$0xff]  ;;  %v1327_v24 = vmov 2102212464   ;;  %p1256_p5 = pnand %p1255_p10, %p1249_p7 }
  0x59   : > { %663 = vmatprep.subr.mxu0 %v638_v26  ;;  %734 = vmatprep.subr.mxu1 %v606_v27  ;;  %v599_v41 = vld [vmem:[#allocation2 + $0x60] sm:$0xff]  ;;  %v598_v43 = vld [vmem:[#allocation2 + $0x58] sm:$0xff]  ;;  %v629_v44 = vld [vmem:[#allocation2 + $0x150] sm:$0xff]  ;;  %v1328_v27 = vmov 920167782  }
  0x5a   : > { %664 = vmatpush1.msra.mxu0 %v637_v28  ;;  %735 = vmatpush1.msra.mxu1 %v605_v29  ;;  %v597_v45 = vld [vmem:[#allocation2 + $0x50] sm:$0xff]  ;;  %v628_v46 = vld [vmem:[#allocation2 + $0x148] sm:$0xff]  ;;  %v627_v48 = vld [vmem:[#allocation2 + $0x140] sm:$0xff] }
  0x5b   : > { %665 = vmatprep.subr.mxu0 %v636_v30  ;;  %736 = vmatprep.subr.mxu1 %v604_v31  ;;  %v596_v47 = vld [vmem:[#allocation2 + $0x48] sm:$0xff]  ;;  %v595_v49 = vld [vmem:[#allocation2 + $0x40] sm:$0xff]  ;;  %v626_v50 = vld [vmem:[#allocation2 + $0x138] sm:$0xff]  ;;  %v1329_v30 = vmov 1326507024  }
  0x5c   : > { %666 = vmatpush1.msra.mxu0 %v635_v32  ;;  %737 = vmatpush1.msra.mxu1 %v603_v33  ;;  %v594_v51 = vld [vmem:[#allocation2 + $0x38] sm:$0xff]  ;;  %v625_v52 = vld [vmem:[#allocation2 + $0x130] sm:$0xff]  ;;  %v624_v54 = vld [vmem:[#allocation2 + $0x128] sm:$0xff] }
  0x5d   : > { %667 = vmatprep.subr.mxu0 %v634_v34  ;;  %738 = vmatprep.subr.mxu1 %v602_v35  ;;  %v593_v53 = vld [vmem:[#allocation2 + $0x30] sm:$0xff]  ;;  %v592_v55 = vld [vmem:[#allocation2 + $0x28] sm:$0xff]  ;;  %v623_v56 = vld [vmem:[#allocation2 + $0x120] sm:$0xff] }
  0x5e   : > { %668 = vmatpush1.msra.mxu0 %v633_v36  ;;  %739 = vmatpush1.msra.mxu1 %v601_v37  ;;  %v591_v57 = vld [vmem:[#allocation2 + $0x20] sm:$0xff]  ;;  %v622_v58 = vld [vmem:[#allocation2 + $0x118] sm:$0xff]  ;;  %v621_v60 = vld [vmem:[#allocation2 + $0x110] sm:$0xff] }
  0x5f   : > { %669 = vmatprep.subr.mxu0 %v632_v38  ;;  %740 = vmatprep.subr.mxu1 %v600_v39  ;;  %v590_v59 = vld [vmem:[#allocation2 + $0x18] sm:$0xff]  ;;  %v589_v61 = vld [vmem:[#allocation2 + $0x10] sm:$0xff]  ;;  %v620_v62 = vld [vmem:[#allocation2 + $0x108] sm:$0xff] }
  0x60   : > { %670 = vmatpush1.msra.mxu0 %v631_v40  ;;  %741 = vmatpush1.msra.mxu1 %v599_v41  ;;  %v588_v63 = vld [vmem:[#allocation2 + $0x8] sm:$0xff]  ;;  %v619_v0 = vld [vmem:[#allocation2 + $0x100] sm:$0xff] }
  0x61   : > { %671 = vmatprep.subr.mxu0 %v630_v42  ;;  %742 = vmatprep.subr.mxu1 %v598_v43  ;;  %v587_v1 = vld [vmem:[#allocation2] sm:$0xff] }
  0x62   : > { %672 = vmatpush1.msra.mxu0 %v629_v44  ;;  %743 = vmatpush1.msra.mxu1 %v597_v45  ;;  %v1055_v3 = vld [vmem:[%s1619_s1] ss:$0 sm:$0xff] }
  0x63   : > { %673 = vmatprep.subr.mxu0 %v628_v46  ;;  %744 = vmatprep.subr.mxu1 %v596_v47 }
  0x64   : > { %674 = vmatpush1.msra.mxu0 %v627_v48  ;;  %745 = vmatpush1.msra.mxu1 %v595_v49 }
  0x65   : > { %675 = vmatprep.subr.mxu0 %v626_v50  ;;  %746 = vmatprep.subr.mxu1 %v594_v51 }
  0x66   : > { %676 = vmatpush1.msra.mxu0 %v625_v52  ;;  %747 = vmatpush1.msra.mxu1 %v593_v53 }
  0x67   : > { %677 = vmatprep.subr.mxu0 %v624_v54  ;;  %748 = vmatprep.subr.mxu1 %v592_v55 }
  0x68   : > { %678 = vmatpush1.msra.mxu0 %v623_v56  ;;  %749 = vmatpush1.msra.mxu1 %v591_v57 }
  0x69   : > { %679 = vmatprep.subr.mxu0 %v622_v58  ;;  %750 = vmatprep.subr.mxu1 %v590_v59 }
  0x6a   : > { %680 = vmatpush1.msra.mxu0 %v621_v60  ;;  %751 = vmatpush1.msra.mxu1 %v589_v61 }
  0x6b   : > { %681 = vmatprep.subr.mxu0 %v620_v62  ;;  %752 = vmatprep.subr.mxu1 %v588_v63 }
  0x6c   : > { %682 = vmatpush1.msra.mxu0 %v619_v0  ;;  %715 = vmatprep.mubr.f32.mxu0 %v1323_v2 }
  0x6d   : > { %753 = vmatpush1.msra.mxu1 %v587_v1  ;;  %786 = vmatprep.mubr.f32.mxu1 %v1323_v2 }
  0xc8   : > { %v371_v4 = vpop.permute.xlu0 %370 }
  0xc9   : > { %v1521_v5 = vmul.f32 %v1055_v3, %v371_v4 }
  0xcb   : > { %v383_v6 = vand.u32 2139095040, %v1521_v5  ;;  %v380_v10 = vand.u32 2147483647, %v1521_v5  ;;  %vm382_vm7 = vcmp.lt.s32.totalorder %v1521_v5, 0  ;;  %vm472_vm15 = vweird.f32 %v1521_v5 }
  0xcd   : > { %v384_v7 = vshrl.u32 %v383_v6, 23  ;;  %v387_v13 = vand.u32 8388607, %v380_v10  ;;  %vm381_vm8 = vcmp.le.f32.partialorder %v380_v10, 0.7853982 }
  0xcf   : > { %v1056_v8 = vadd.s32 4294967169, %v384_v7  ;;  %v388_v32 = vor.u32 8388608, %v387_v13 }
  0xd1   : > { %v390_v9 = vadd.s32 1, %v1056_v8  ;;  %v428_v46 = vshll.u32 %v388_v32, 8 }
  0xd3   : > { %vm391_vm0 = vcmp.gt.s32.totalorder %v390_v9, 0 }
  0xd4   : > { %v392_v11 = vsel %vm391_vm0, %v390_v9, 0 }
  0xd5   : > { %v394_v12 = vand.u32 31, %v392_v11  ;;  %v393_v15 = vshrl.u32 %v392_v11, 5 }
  0xd7   : > { %v395_v14 = vsub.s32 32, %v394_v12  ;;  %v397_v17 = vshll.u32 %v1324_v16, %v394_v12  ;;  %v400_v19 = vshll.u32 %v1325_v18, %v394_v12  ;;  %v403_v23 = vshll.u32 %v1326_v21, %v394_v12 }
  0xd8   : > { %v406_v26 = vshll.u32 %v1327_v24, %v394_v12  ;;  %v409_v29 = vshll.u32 %v1328_v27, %v394_v12  ;;  %vm412_vm1 = vcmp.lt.s32.totalorder %v393_v15, 1  ;;  %vm415_vm2 = vcmp.lt.s32.totalorder %v393_v15, 4 }
  0xd9   : > { %v398_v20 = vshrl.u32 %v1325_v18, %v395_v14  ;;  %v401_v22 = vshrl.u32 %v1326_v21, %v395_v14  ;;  %v404_v25 = vshrl.u32 %v1327_v24, %v395_v14  ;;  %v407_v28 = vshrl.u32 %v1328_v27, %v395_v14 }
  0xda   : > { %v410_v31 = vshrl.u32 %v1329_v30, %v395_v14  ;;  %v396_v41 = vshrl.u32 %v1324_v16, %v395_v14  ;;  %vm414_vm3 = vcmp.lt.s32.totalorder %v393_v15, 3  ;;  %vm413_vm4 = vcmp.lt.s32.totalorder %v393_v15, 2 }
  0xdb   : > { %v399_v33 = vor.u32 %v398_v20, %v397_v17  ;;  %v402_v34 = vor.u32 %v401_v22, %v400_v19  ;;  %v405_v35 = vor.u32 %v404_v25, %v403_v23  ;;  %v408_v36 = vor.u32 %v407_v28, %v406_v26 }
  0xdc   : > { %v411_v37 = vor.u32 %v410_v31, %v409_v29 }
  0xdd   : > { %v417_v38 = vsel %vm415_vm2, %v405_v35, 2102212464  ;;  %v420_v39 = vsel %vm412_vm1, %v399_v33, %v402_v34  ;;  %v424_v40 = vsel %vm412_vm1, %v402_v34, %v405_v35  ;;  %v421_v42 = vsel %vm415_vm2, %v408_v36, 920167782 }
  0xde   : > { %v425_v43 = vsel %vm415_vm2, %v411_v37, 1326507024  ;;  %v422_v44 = vsel %vm414_vm3, %v405_v35, %v421_v42  ;;  %v416_v47 = vsel %vm412_vm1, %v396_v41, %v399_v33  ;;  %v418_v48 = vsel %vm414_vm3, %v402_v34, %v417_v38  ;;  %v851_v41 = vld [vmem:[%s1509_s30 + $0xf0] sm:$0xff] }
  0xdf   : > { %v426_v45 = vsel %vm414_vm3, %v408_v36, %v425_v43  ;;  %v423_v49 = vsel %vm413_vm4, %v420_v39, %v422_v44  ;;  %v419_v55 = vsel %vm413_vm4, %v416_v47, %v418_v48  ;;  %v852_v39 = vld [vmem:[%s1509_s30 + $0xf8] sm:$0xff]  ;;  %v835_v42 = vld [vmem:[%s1509_s30 + $0x70] sm:$0xff]  ;;  %v834_v43 = vld [vmem:[%s1509_s30 + $0x68] sm:$0xff] }
  0xe0   : > { %v427_v50 = vsel %vm413_vm4, %v424_v40, %v426_v45  ;;  %v1530_v53 = vmul.u32.u64.low %v428_v46, %v423_v49  ;;  %v1531_v54 = vmul.u32.u64.high %v428_v46, %v423_v49, %v1530_v53  ;;  %v435_v57 = vmul.u32 %v428_v46, %v419_v55  ;;  %1071 = vmatprep.subr.mxu0 %v852_v39  ;;  %v836_v40 = vld [vmem:[%s1509_s30 + $0x78] sm:$0xff]  ;;  %v849_v44 = vld [vmem:[%s1509_s30 + $0xe0] sm:$0xff]  ;;  %v847_v48 = vld [vmem:[%s1509_s30 + $0xd0] sm:$0xff] }
  0xe1   : > { %v1527_v51 = vmul.u32.u64.low %v428_v46, %v427_v50  ;;  %v1528_v52 = vmul.u32.u64.high %v428_v46, %v427_v50, %v1527_v51  ;;  %v833_v45 = vld [vmem:[%s1509_s30 + $0x60] sm:$0xff]  ;;  %v848_v46 = vld [vmem:[%s1509_s30 + $0xd8] sm:$0xff]  ;;  %v831_v49 = vld [vmem:[%s1509_s30 + $0x50] sm:$0xff] }
  0xe2   : > { %v438_v56 = vadd.s32 1, %v1531_v54  ;;  %v832_v47 = vld [vmem:[%s1509_s30 + $0x58] sm:$0xff]  ;;  %v846_v50 = vld [vmem:[%s1509_s30 + $0xc8] sm:$0xff] }
  0xe3   : > { %vm437_vm5 = vc.u32 %v1528_v52, %v1530_v53  ;;  %v436_v6 = vadd.s32 %v1530_v53, %v1528_v52  ;;  %v830_v51 = vld [vmem:[%s1509_s30 + $0x48] sm:$0xff]  ;;  %v845_v52 = vld [vmem:[%s1509_s30 + $0xc0] sm:$0xff]  ;;  %v828_v55 = vld [vmem:[%s1509_s30 + $0x38] sm:$0xff] }
  0xe4   : > { %v439_v58 = vsel %vm437_vm5, %v438_v56, %v1531_v54  ;;  %v829_v53 = vld [vmem:[%s1509_s30 + $0x40] sm:$0xff]  ;;  %v844_v54 = vld [vmem:[%s1509_s30 + $0xb8] sm:$0xff]  ;;  %v843_v56 = vld [vmem:[%s1509_s30 + $0xb0] sm:$0xff] }
  0xe5   : > { %v440_v59 = vadd.s32 %v439_v58, %v435_v57  ;;  %v827_v57 = vld [vmem:[%s1509_s30 + $0x30] sm:$0xff]  ;;  %v842_v58 = vld [vmem:[%s1509_s30 + $0xa8] sm:$0xff] }
  0xe7   : > { %v441_v60 = vadd.s32 536870912, %v440_v59 }
  0xe9   : > { %v442_v61 = vshrl.u32 %v441_v60, 30  ;;  %v841_v60 = vld [vmem:[%s1509_s30 + $0xa0] sm:$0xff] }
  0xeb   : > { %v443_v62 = vshll.u32 %v442_v61, 30  ;;  %v466_v20 = vsub.s32 4, %v442_v61 }
  0xed   : > { %v444_v63 = vsub.s32 %v440_v59, %v443_v62  ;;  %v467_v23 = vsel %vm382_vm7, %v466_v20, %v442_v61  ;;  %v826_v59 = vld [vmem:[%s1509_s30 + $0x28] sm:$0xff]  ;;  %v825_v61 = vld [vmem:[%s1509_s30 + $0x20] sm:$0xff]  ;;  %v840_v62 = vld [vmem:[%s1509_s30 + $0x98] sm:$0xff] }
  0xee   : > { %v469_v24 = vsel %vm381_vm8, 0, %v467_v23 }
  0xef   : > { %v446_v0 = vsub.s32 0, %v444_v63  ;;  %v576_v25 = vadd.s32 3, %v469_v24  ;;  %v473_v27 = vand.u32 3, %v469_v24 }
  0xf1   : > { %v1057_v1 = vmin.u32 %v446_v0, %v444_v63  ;;  %v577_v26 = vand.u32 3, %v576_v25  ;;  %vm478_vm10 = vcmp.eq.s32.totalorder %v473_v27, 2  ;;  %vm475_vm12 = vcmp.eq.s32.totalorder %v473_v27, 0  ;;  %v839_v0 = vld [vmem:[%s1509_s30 + $0x90] sm:$0xff] }
  0xf2   : > { %vm474_vm14 = vcmp.lt.s32.totalorder %v473_v27, 2 }
  0xf3   : > { %v448_v2 = vclz %v1057_v1  ;;  %vm582_vm9 = vcmp.eq.s32.totalorder %v577_v26, 2  ;;  %vm579_vm11 = vcmp.eq.s32.totalorder %v577_v26, 0  ;;  %vm578_vm13 = vcmp.lt.s32.totalorder %v577_v26, 2  ;;  %v823_v1 = vld [vmem:[%s1509_s30 + $0x10] sm:$0xff] }
  0xf5   : > { %v1058_v3 = vadd.s32 4294967294, %v448_v2  ;;  %v838_v2 = vld [vmem:[%s1509_s30 + $0x88] sm:$0xff] }
  0xf7   : > { %vm1059_vm6 = vcmp.lt.s32.totalorder %v1058_v3, 0 }
  0xf8   : > { %v451_v4 = vsel %vm1059_vm6, 0, %v1058_v3  ;;  %v822_v3 = vld [vmem:[%s1509_s30 + $0x8] sm:$0xff] }
  0xf9   : > { %v452_v7 = vsub.s32 32, %v451_v4  ;;  %v456_v8 = vsub.s32 4294967266, %v451_v4  ;;  %v453_v9 = vshll.u32 %v444_v63, %v451_v4  ;;  %v824_v63 = vld [vmem:[%s1509_s30 + $0x18] sm:$0xff]  ;;  %v837_v4 = vld [vmem:[%s1509_s30 + $0x80] sm:$0xff] }
  0xfb   : > { %v454_v11 = vshrl.u32 %v436_v6, %v452_v7  ;;  %v457_v12 = vadd.s32 127, %v456_v8  ;;  %v821_v6 = vld [vmem:[%s1509_s30] sm:$0xff]  ;;  %v795_v7 = vlaneseq }
  0xfd   : > { %v455_v13 = vor.u32 %v454_v11, %v453_v9  ;;  %v458_v14 = vshll.u32 %v457_v12, 23  ;;  %v796_v8 = vshrl.u32 %v795_v7, 7  ;;  %v793_v11 = vld [vmem:[%s1621_s3] sm:$0x3] }
  0xff   : > { %v459_v15 = vor.u32 4788187, %v458_v14  ;;  %v462_v17 = vcvt.s32.f32 %v455_v13  ;;  %v797_v9 = vsub.s32 0, %v796_v8  ;;  %v801_v12 = vsub.s32 1, %v796_v8 }
 0x101   : > { %v460_v16 = vand.u32 2147483647, %v459_v15  ;;  %v798_v13 = vrot.slane %v793_v11, %v797_v9 }
 0x103   : > { %v463_v18 = vmul.f32 %v462_v17, %v460_v16  ;;  %v802_v17 = vrot.slane %v793_v11, %v801_v12 }
 0x105   : > { %v464_v19 = vxor.u32 2147483648, %v463_v18 }
 0x107   : > { %v465_v21 = vsel %vm382_vm7, %v464_v19, %v463_v18 }
 0x108   : > { %v468_v22 = vsel %vm381_vm8, %v1521_v5, %v465_v21  ;;  %v850_v5 = vld [vmem:[%s1509_s30 + $0xe8] sm:$0xff] }
 0x109   : > { %1180 = vcosq.f32 %v468_v22 }
 0x10a   : > { %1182 = vsinq.f32 %v468_v22 }
 0x116   : > { %v1181_v28 = vpop.eup %1180 }
 0x117   : > { %v1183_v29 = vpop.eup %1182  ;;  %v479_v30 = vxor.u32 2147483648, %v1181_v28 }
 0x118   : > { %v476_v31 = vxor.u32 2147483648, %v1183_v29 }
 0x119   : > { %v584_v32 = vsel %vm582_vm9, %v479_v30, %v1183_v29  ;;  %v480_v10 = vsel %vm478_vm10, %v479_v30, %v1183_v29 }
 0x11a   : > { %v581_v33 = vsel %vm579_vm11, %v1181_v28, %v476_v31  ;;  %v477_v34 = vsel %vm475_vm12, %v1181_v28, %v476_v31 }
 0x11b   : > { %v585_v35 = vsel %vm578_vm13, %v581_v33, %v584_v32  ;;  %v481_v36 = vsel %vm474_vm14, %v477_v34, %v480_v10  ;;  %v1066_v33 = vld [vmem:[%s362_s19] ss:$0 sm:$0xff] }
 0x11c   : > { %v586_v37 = vsel %vm472_vm15, nan, %v585_v35  ;;  %v482_v38 = vsel %vm472_vm15, nan, %v481_v36 }
 0x11d   : > { %716 = vmatmul.mubr.f32.vlgmr.msra.gmra.mxu0 %v586_v37  ;;  %787 = vmatmul.mubr.f32.vlgmr.msra.gmra.mxu1 %v482_v38 }
 0x11e   : > { %1072 = vmatpush3.msra.mxu0 %v836_v40 }
 0x11f   : > { %1073 = vmatprep.subr.mxu0 %v851_v41 }
 0x120   : > { %1074 = vmatpush3.msra.mxu0 %v835_v42 }
 0x121   : > { %1075 = vmatprep.subr.mxu0 %v850_v5 }
 0x122   : > { %1076 = vmatpush3.msra.mxu0 %v834_v43 }
 0x123   : > { %1077 = vmatprep.subr.mxu0 %v849_v44 }
 0x124   : > { %1078 = vmatpush3.msra.mxu0 %v833_v45 }
 0x125   : > { %1079 = vmatprep.subr.mxu0 %v848_v46 }
 0x126   : > { %1080 = vmatpush3.msra.mxu0 %v832_v47 }
 0x127   : > { %1081 = vmatprep.subr.mxu0 %v847_v48 }
 0x128   : > { %1082 = vmatpush3.msra.mxu0 %v831_v49 }
 0x129   : > { %1083 = vmatprep.subr.mxu0 %v846_v50 }
 0x12a   : > { %1084 = vmatpush3.msra.mxu0 %v830_v51 }
 0x12b   : > { %1085 = vmatprep.subr.mxu0 %v845_v52 }
 0x12c   : > { %1086 = vmatpush3.msra.mxu0 %v829_v53 }
 0x12d   : > { %1087 = vmatprep.subr.mxu0 %v844_v54 }
 0x12e   : > { %1088 = vmatpush3.msra.mxu0 %v828_v55 }
 0x12f   : > { %1089 = vmatprep.subr.mxu0 %v843_v56 }
 0x130   : > { %1090 = vmatpush3.msra.mxu0 %v827_v57 }
 0x131   : > { %1091 = vmatprep.subr.mxu0 %v842_v58 }
 0x132   : > { %1092 = vmatpush3.msra.mxu0 %v826_v59 }
 0x133   : > { %1093 = vmatprep.subr.mxu0 %v841_v60 }
 0x134   : > { %1094 = vmatpush3.msra.mxu0 %v825_v61 }
 0x135   : > { %1095 = vmatprep.subr.mxu0 %v840_v62 }
 0x136   : > { %1096 = vmatpush3.msra.mxu0 %v824_v63 }
 0x137   : > { %1097 = vmatprep.subr.mxu0 %v839_v0 }
 0x138   : > { %1098 = vmatpush3.msra.mxu0 %v823_v1 }
 0x139   : > { %1099 = vmatprep.subr.mxu0 %v838_v2 }
 0x13a   : > { %1100 = vmatpush3.msra.mxu0 %v822_v3 }
 0x13b   : > { %1101 = vmatprep.subr.mxu0 %v837_v4 }
 0x13c   : > { %1102 = vmatpush3.msra.mxu0 %v821_v6 }
 0x1dd   : > { %v717_v14 = vpop.f32.mrf.mxu0  ;;  %v788_v15 = vpop.f32.mrf.mxu1 }
 0x1de   : > { %v789_v16 = vadd.f32 %v788_v15, %v717_v14 }
 0x1df   : > { %v719_v18 = vpop.f32.mrf.mxu0  ;;  %v790_v19 = vpop.f32.mrf.mxu1 }
 0x1e0   : > { %v805_v20 = vadd.f32 %v798_v13, %v789_v16  ;;  %v791_v21 = vadd.f32 %v790_v19, %v719_v18 }
 0x1e2   : > { %v1064_v22 = vmul.f32 -1.442695, %v805_v20  ;;  %v806_v23 = vadd.f32 %v802_v17, %v791_v21 }
 0x1e4   : > { %1184 = vpow2.f32 %v1064_v22  ;;  %v1065_v24 = vmul.f32 -1.442695, %v806_v23 }
 0x1e6   : > { %1186 = vpow2.f32 %v1065_v24 }
 0x1f1   : > { %v1185_v25 = vpop.eup %1184 }
 0x1f2   : > { %v813_v26 = vadd.f32 1.0, %v1185_v25 }
 0x1f3   : > { %v1187_v27 = vpop.eup %1186 }
 0x1f4   : > { %v814_v28 = vadd.f32 1.0, %v1187_v27  ;;  %1188 = vrcp.f32 %v813_v26 }
 0x1f6   : > { %1190 = vrcp.f32 %v814_v28 }
 0x201   : > { %v1189_v29 = vpop.eup %1188 }
 0x202   : > { %v819_v32 = vmul.f32 %v1189_v29, %v805_v20 }
 0x203   : > { %v1191_v30 = vpop.eup %1190 }
 0x204   : > { %v820_v31 = vmul.f32 %v1191_v30, %v806_v23 }
 0x206   : > { %924 = vmatprep.mubr.f32.mxu0 %v820_v31 }
 0x207   : > { %925 = vmatmul.mubr.f32.vlgmr.msra.gmra.mxu0 %v819_v32 }
 0x2c7   : > { %v1103_v10 = vpop.f32.mrf.mxu0 }
 0x2c9   : > { %v1104_v34 = vpop.f32.mrf.mxu0 }
 0x2ca   : > { %v1105_v35 = vadd.f32 %v1104_v34, %v1103_v10 }
 0x2cc   : > { %v927_v36 = vadd.f32 %v1105_v35, %v1066_v33 }
 0x2ce   : > { %930 = vst [vmem:[%s359_s18] sm:$0xff] %v927_v36 }
 0x2cf   : > { %1259 = shalt.err (!%p1256_p5)
}
 0x2d0   : > { %s1260_s21 = scalar_lea.hbm %s943_s17, 128  ;;  %s1264_s20 = scalar_lea.hbm %s1626_s8, 256 }
 0x2d1   : > { %p1261_p11 = scmp.ne.s32.totalorder %s943_s17, %s1260_s21  ;;  %p1265_p13 = scmp.lt.s32.totalorder %s943_s17, %s1626_s8 }
 0x2d2   : > { %p1266_p4 = scmp.lt.s32.totalorder %s1264_s20, %s1260_s21 }
 0x2d3   : > { %p1262_p6 = pnand %p1261_p11, %p1643_p2 }
 0x2d4   : > { %p1267_p0 = por %p1266_p4, %p1265_p13 }
 0x2d5   : > { %p1263_p12 = pneg %p1262_p6 }
 0x2d7   : > { %p1268_p1 = pnand %p1267_p0, %p1263_p12 }
 0x2d9   : > { %1271 = shalt.err (!%p1268_p1)
}
 0x2da   : > { %1116 = dma.vmem_to_hbm [thread:$0]  (%p1643_p2), %s946_s22, 128, %s943_s17, %s932_s14  }
 0x2db PF: > { %s957_s26 = sand.u32 1, %s1302_s27   ;;  %p1644_p3 = scmp.ne.s32.totalorder %s1635_s16, 0 }
 0x2dc   : > { %p1645_p7 = scmp.ge.s32.totalorder %s1314_s29, 2  ;;  %s958_s18 = scalar_lea.sflag [#allocation4], %s957_s26 }
 0x2de   : > { %p1127_p8 = pnand %p1645_p7, %p1644_p3 }
 0x2e0   : > { %p1128_p9 = pneg %p1127_p8 }
 0x2e2   : > { %1297 = dma.done.wait (%p1128_p9), %s958_s18, 128  }
 0x2e3   : > { %1299 = vsyncadd (%p1128_p9), %s958_s18, 4294967168  ;;  %s1646_s30 = sld [smem:[#allocation11_spill]]  ;;  %p22_p10 = scmp.ge.s32.totalorder %s1401_s9, 4  }
 0x2e4   : > { %s1647_s27 = smov %s1306_s4  ;;  %s1648_s4 = smov %s1310_s28 }
 0x2e5   : > { %s1650_s29 = smov %s1401_s9  ;;  %24 = sbr.rel (!%p22_p10) target bundleno = 6 (0x6), region = 108 }
 0x2e9   : > { %s1649_s28 = smov %s1646_s30 }
 0x2ea   :  { %963 = vsyncpa [#allocation3], 1 }
 0x2eb   :  { %965 = vsyncpa [#allocation3 + $0x1], 1 }
 0x2ec   :  { %966 = vsyncpa [#allocation6], 1 }
 0x2ed   :  { %968 = vsyncpa [#allocation6 + $0x1], 1 }
 0x2ee   :  { %969 = vsyncpa [#allocation4], 1 }
 0x2ef   :  { %971 = vsyncpa [#allocation4 + $0x1], 1 }

</bundles_post_ra>
